<compile_context>
chip_gen: v6e
topology: v6e:2x2x1
jax: 0.10.0
libtpu: 0.0.40
codegen_flags: <defaults>
</compile_context>

<pallas_src>
import jax
import jax.numpy as jnp
from jax import lax
from jax.experimental import pallas as pl
from jax.experimental.pallas import tpu as pltpu

_MIB = 1024 * 1024
# Per-block VMEM working-set target; 2x this stays under v7x's 64 MiB per-TC VMEM.
_VMEM_BUDGET = 24 * _MIB


def _round_up(x, m):
    return ((x + m - 1) // m) * m


def _vmem_limit(working_set_bytes):
    return int(min(max(2 * working_set_bytes, 32 * _MIB), 64 * _MIB))


# ---------------------------------------------------------------------------
# Manual HBM row-gather helpers (large-table path).
# ---------------------------------------------------------------------------

def _issue_row_gather(ids_ref, emb_hbm, dst_ref, sem, base, n_rows, slot=None):
    """Issue n_rows single-row copies emb_hbm[ids[base+r]] -> dst row r.

    All copies share one DMA semaphore and are drained later with a single
    wait covering the whole destination (byte counts match: each copy moves
    exactly one d_embed row of the same dtype).
    """

    def issue(r, carry):
        tok = ids_ref[base + r]
        if slot is None:
            dst = dst_ref.at[pl.ds(r, 1)]
        else:
            dst = dst_ref.at[slot, pl.ds(r, 1)]
        pltpu.make_async_copy(emb_hbm.at[pl.ds(tok, 1)], dst, sem).start()
        return carry

    # Unrolled issue loop: each issue is one scalar id read + one descriptor on
    # the vector-misc slot; unrolling packs issues near the 1/cycle ceiling.
    lax.fori_loop(0, n_rows, issue, 0, unroll=8)


def _wait_row_gather(dst_view, sem):
    """One wait for all previously issued row copies on `sem`.

    Only the descriptor's byte count matters for wait(); using the destination
    view for both ends keeps the descriptor in-bounds even if t_tok > n_tokens.
    """
    pltpu.make_async_copy(dst_view, dst_view, sem).wait()


# ---------------------------------------------------------------------------
# Kernels: large table (HBM-resident, manual DMA gather).
# ---------------------------------------------------------------------------

def _gather_kernel(ids_ref, emb_hbm, o_ref, sem):
    # grid = (token_blocks,): gather rows straight into the pipelined output
    # block (no staging scratch, no VMEM->VMEM copy); pure HBM-bandwidth path.
    i = pl.program_id(0)
    t_tok = o_ref.shape[0]
    _issue_row_gather(ids_ref, emb_hbm, o_ref, sem, i * t_tok, t_tok)
    _wait_row_gather(o_ref, sem)


def _gather_project_kernel(ids_ref, emb_hbm, w_ref, o_ref, rows_ref, sem):
    # grid = (token_blocks, d_model_tiles), both "arbitrary": one core walks
    # the grid sequentially from i=0, which the cross-block prefetch relies on.
    # TODO(synk): partition-aware priming so the token axis can be "parallel"
    # (v7x megacore) while keeping the gather prefetch.
    i = pl.program_id(0)
    j = pl.program_id(1)
    num_tb = pl.num_programs(0)
    t_tok = rows_ref.shape[1]
    slot = i % 2

    @pl.when(j == 0)
    def _():
        # Block 0's gather was never prefetched: prime it.
        @pl.when(i == 0)
        def _():
            _issue_row_gather(ids_ref, emb_hbm, rows_ref, sem.at[0],
                              0, t_tok, slot=0)

        # Prefetch the next token block's rows into the other slot; the DMAs
        # overlap with all d_model-tile matmuls of the current block.
        @pl.when(i + 1 < num_tb)
        def _():
            _issue_row_gather(ids_ref, emb_hbm, rows_ref, sem.at[1 - slot],
                              (i + 1) * t_tok, t_tok, slot=1 - slot)

        # Current block's rows must have landed before its first matmul.
        _wait_row_gather(rows_ref.at[slot], sem.at[slot])

    # (t_tok, d_embed) @ (d_embed, t_n) on the MXU, f32 accumulation.
    o_ref[...] = jnp.dot(
        rows_ref[slot], w_ref[...], preferred_element_type=jnp.float32
    ).astype(o_ref.dtype)


# ---------------------------------------------------------------------------
# Kernels: small table (VMEM-resident, one-hot MXU gather).
# ---------------------------------------------------------------------------

def _small_gather_kernel(ids_ref, emb_ref, o_ref):
    t_tok = ids_ref.shape[0]
    n_tok = emb_ref.shape[0]
    onehot = (
        ids_ref[...] == lax.broadcasted_iota(jnp.int32, (t_tok, n_tok), 1)
    ).astype(emb_ref.dtype)
    o_ref[...] = jnp.dot(
        onehot, emb_ref[...], preferred_element_type=jnp.float32
    ).astype(o_ref.dtype)


def _small_gather_project_kernel(ids_ref, emb_ref, w_ref, o_ref):
    t_tok = ids_ref.shape[0]
    n_tok = emb_ref.shape[0]
    onehot = (
        ids_ref[...] == lax.broadcasted_iota(jnp.int32, (t_tok, n_tok), 1)
    ).astype(emb_ref.dtype)
    rows = jnp.dot(onehot, emb_ref[...], preferred_element_type=jnp.float32)
    o_ref[...] = jnp.dot(
        rows.astype(w_ref.dtype), w_ref[...], preferred_element_type=jnp.float32
    ).astype(o_ref.dtype)


# ---------------------------------------------------------------------------
# Wrapper.
# ---------------------------------------------------------------------------

def embedding_forward(
    x,
    emb_table,
    w_t=None,
    *,
    block_tokens=256,
    block_n=512,
    small_table_bytes=2 * _MIB,
):
    """x: int [B, S] token ids; emb_table: [n_tokens, d_embed];
    w_t: optional [d_embed, d_model] (PyTorch nn.Linear weight, transposed)."""
    B, S = x.shape
    n_tokens, d_embed = emb_table.shape
    esize = jnp.dtype(emb_table.dtype).itemsize
    ids = x.reshape(-1).astype(jnp.int32)
    N = ids.shape[0]

    # Token block: multiple of 8 sublanes, capped at block_tokens.
    t_tok = block_tokens if N >= block_tokens else _round_up(max(N, 8), 8)
    n_pad = _round_up(N, t_tok)
    if n_pad != N:
        ids = jnp.pad(ids, (0, n_pad - N))  # pad with token 0 (always in range)
    num_tb = n_pad // t_tok

    small_table = n_tokens * d_embed * esize <= small_table_bytes

    # TODO(synk): optional bf16 storage of table/W (halves HBM traffic, native
    # MXU rate) behind a flag; kept in the caller's dtype to preserve numerics.

    if w_t is None:
        d_model = d_embed
        if small_table:
            out = pl.pallas_call(
                _small_gather_kernel,
                out_shape=jax.ShapeDtypeStruct((n_pad, d_embed), emb_table.dtype),
                grid=(num_tb,),
                in_specs=[
                    pl.BlockSpec((t_tok, 1), lambda i: (i, 0)),
                    pl.BlockSpec((n_tokens, d_embed), lambda i: (0, 0)),
                ],
                out_specs=pl.BlockSpec((t_tok, d_embed), lambda i: (i, 0)),
                compiler_params=pltpu.CompilerParams(
                    dimension_semantics=("parallel",),
                ),
            )(ids.reshape(n_pad, 1), emb_table)
        else:
            ws = 2 * t_tok * d_embed * esize  # double-buffered output blocks
            out = pl.pallas_call(
                _gather_kernel,
                out_shape=jax.ShapeDtypeStruct((n_pad, d_embed), emb_table.dtype),
                grid_spec=pltpu.PrefetchScalarGridSpec(
                    num_scalar_prefetch=1,
                    grid=(num_tb,),
                    in_specs=[pl.BlockSpec(memory_space=pl.ANY)],  # table in HBM
                    out_specs=pl.BlockSpec(
                        (t_tok, d_embed), lambda i, ids_ref: (i, 0)
                    ),
                    scratch_shapes=[pltpu.SemaphoreType.DMA],
                ),
                compiler_params=pltpu.CompilerParams(
                    dimension_semantics=("parallel",),
                    vmem_limit_bytes=_vmem_limit(ws),
                ),
            )(ids, emb_table)
        out = out[:N]
    else:
        d_model = w_t.shape[1]
        dm_pad = _round_up(d_model, 128)  # lane-dense weight tiles / out slabs
        if dm_pad != d_model:
            w_t = jnp.pad(w_t, ((0, 0), (0, dm_pad - d_model)))
        wsize = jnp.dtype(w_t.dtype).itemsize

        rows_bytes = 2 * t_tok * d_embed * esize  # double-buffered gather slots

        def working_set(tn):
            return rows_bytes + 2 * d_embed * tn * wsize + 2 * t_tok * tn * esize

        # Prefer one resident d_model tile (constant W index -> W is streamed
        # from HBM exactly once instead of once per token block).
        if working_set(dm_pad) <= _VMEM_BUDGET:
            t_n = dm_pad
        else:
            t_n = min(block_n, dm_pad)
            while dm_pad % t_n:
                t_n -= 128
            while t_n > 128 and working_set(t_n) > _VMEM_BUDGET:
                t_n -= 128
                while t_n > 128 and dm_pad % t_n:
                    t_n -= 128
        num_nb = dm_pad // t_n

        if small_table:
            ws = (n_tokens * d_embed * esize
                  + 2 * d_embed * t_n * wsize + 2 * t_tok * t_n * esize)
            out = pl.pallas_call(
                _small_gather_project_kernel,
                out_shape=jax.ShapeDtypeStruct((n_pad, dm_pad), emb_table.dtype),
                grid=(num_tb, num_nb),
                in_specs=[
                    pl.BlockSpec((t_tok, 1), lambda i, j: (i, 0)),
                    pl.BlockSpec((n_tokens, d_embed), lambda i, j: (0, 0)),
                    pl.BlockSpec((d_embed, t_n), lambda i, j: (0, j)),
                ],
                out_specs=pl.BlockSpec((t_tok, t_n), lambda i, j: (i, j)),
                compiler_params=pltpu.CompilerParams(
                    dimension_semantics=("parallel", "arbitrary"),
                    vmem_limit_bytes=_vmem_limit(ws),
                ),
            )(ids.reshape(n_pad, 1), emb_table, w_t)
        else:
            out = pl.pallas_call(
                _gather_project_kernel,
                out_shape=jax.ShapeDtypeStruct((n_pad, dm_pad), emb_table.dtype),
                grid_spec=pltpu.PrefetchScalarGridSpec(
                    num_scalar_prefetch=1,
                    grid=(num_tb, num_nb),
                    in_specs=[
                        pl.BlockSpec(memory_space=pl.ANY),  # table stays in HBM
                        pl.BlockSpec((d_embed, t_n), lambda i, j, ids_ref: (0, j)),
                    ],
                    out_specs=pl.BlockSpec(
                        (t_tok, t_n), lambda i, j, ids_ref: (i, j)
                    ),
                    scratch_shapes=[
                        pltpu.VMEM((2, t_tok, d_embed), emb_table.dtype),
                        pltpu.SemaphoreType.DMA((2,)),
                    ],
                ),
                compiler_params=pltpu.CompilerParams(
                    # "arbitrary" on both axes: the cross-block gather prefetch
                    # needs one core to sweep the grid sequentially from i=0.
                    dimension_semantics=("arbitrary", "arbitrary"),
                    vmem_limit_bytes=_vmem_limit(working_set(t_n)),
                ),
            )(ids, emb_table, w_t)
        out = out[:N, :d_model]

    return out.reshape(B, S, d_model)


if __name__ == "__main__":
    # Module hyper-parameters (d_model != d_embed -> projection path is used).
    n_tokens, d_embed, d_model = 32, 32, 64
    B, S = 2, 8

    key = jax.random.PRNGKey(0)
    k_emb, k_w, k_x = jax.random.split(key, 3)

    # nn.Embedding default init: N(0, 1)
    emb_table = jax.random.normal(k_emb, (n_tokens, d_embed), dtype=jnp.float32)
    # nn.Linear default init: U(-1/sqrt(fan_in), 1/sqrt(fan_in)); PyTorch weight
    # is [d_model, d_embed] -> store transposed [d_embed, d_model].
    bound = 1.0 / (d_embed ** 0.5)
    w = jax.random.uniform(
        k_w, (d_model, d_embed), dtype=jnp.float32, minval=-bound, maxval=bound
    )
    w_t = w.T

    x = jax.random.randint(k_x, (B, S), 0, n_tokens, dtype=jnp.int32)

    gathered = jnp.take(emb_table, x.reshape(-1), axis=0)
    y_proj_ref = (gathered @ w_t).reshape(B, S, d_model)
    y_emb_ref = gathered.reshape(B, S, d_embed)

    # Small-table fast path (VMEM-resident table, one-hot MXU gather).
    y = jax.block_until_ready(embedding_forward(x, emb_table, w_t))
    assert y.shape == (B, S, d_model)
    assert jnp.allclose(y, y_proj_ref, atol=1e-5, rtol=1e-5)

    y2 = jax.block_until_ready(embedding_forward(x, emb_table, None))
    assert y2.shape == (B, S, d_embed)
    assert jnp.allclose(y2, y_emb_ref, atol=1e-6, rtol=1e-6)

    # Large-table path (HBM table + double-buffered manual DMA gather), forced
    # by setting the small-table threshold to zero.
    y3 = jax.block_until_ready(
        embedding_forward(x, emb_table, w_t, small_table_bytes=0)
    )
    assert jnp.allclose(y3, y_proj_ref, atol=1e-5, rtol=1e-5)

    y4 = jax.block_until_ready(
        embedding_forward(x, emb_table, None, small_table_bytes=0)
    )
    assert jnp.allclose(y4, y_emb_ref, atol=1e-6, rtol=1e-6)

    print("KERNEL_OK")
</pallas_src>

<mosaic_0001>
module attributes {stable_mosaic.version = 11 : i64} {
  func.func @_small_gather_project_kernel(%arg0: i32, %arg1: i32, %arg2: memref<16x1xi32, #tpu.memory_space<vmem>>, %arg3: memref<32x32xf32, #tpu.memory_space<vmem>>, %arg4: memref<32x128xf32, #tpu.memory_space<vmem>>, %arg5: memref<16x128xf32, #tpu.memory_space<vmem>>) attributes {dimension_semantics = [#tpu.dimension_semantics<parallel>, #tpu.dimension_semantics<arbitrary>], iteration_bounds = array<i64: 1, 1>, scalar_prefetch = 0 : i64, scratch_operands = 0 : i64, tpu.core_type = #tpu.core_type<tc>, window_params = [{transform_indices = @transform_0, window_bounds = array<i64: 16, 1>}, {pipeline_mode = #tpu.pipeline_mode<synchronous>, transform_indices = @transform_1, window_bounds = array<i64: 32, 32>}, {transform_indices = @transform_2, window_bounds = array<i64: 32, 128>}, {transform_indices = @transform_3, window_bounds = array<i64: 16, 128>}]} {
    %c0 = arith.constant 0 : index
    %c0_0 = arith.constant 0 : index
    %0 = vector.load %arg2[%c0, %c0_0] : memref<16x1xi32, #tpu.memory_space<vmem>>, vector<16x1xi32>
    %1 = tpu.iota {dimensions = array<i32: 1>} : vector<16x32xi32>
    %2 = vector.broadcast %0 : vector<16x1xi32> to vector<16x32xi32>
    %3 = arith.cmpi eq, %2, %1 : vector<16x32xi32>
    %4 = arith.extui %3 : vector<16x32xi1> to vector<16x32xi32>
    %5 = arith.sitofp %4 : vector<16x32xi32> to vector<16x32xf32>
    %c0_1 = arith.constant 0 : index
    %c0_2 = arith.constant 0 : index
    %6 = vector.load %arg3[%c0_1, %c0_2] : memref<32x32xf32, #tpu.memory_space<vmem>>, vector<32x32xf32>
    %cst = arith.constant dense<0.000000e+00> : vector<16x32xf32>
    %7 = tpu.matmul %5, %6, %cst {dimension_numbers = #tpu.dot_dimension_numbers<[1], [0], [0], [1], [0, 0, 1, 1], [], []>} : vector<16x32xf32>, vector<32x32xf32>, vector<16x32xf32> -> vector<16x32xf32>
    %c0_3 = arith.constant 0 : index
    %c0_4 = arith.constant 0 : index
    %8 = vector.load %arg4[%c0_3, %c0_4] : memref<32x128xf32, #tpu.memory_space<vmem>>, vector<32x128xf32>
    %cst_5 = arith.constant dense<0.000000e+00> : vector<16x128xf32>
    %9 = tpu.matmul %7, %8, %cst_5 {dimension_numbers = #tpu.dot_dimension_numbers<[1], [0], [0], [1], [0, 0, 1, 1], [], []>} : vector<16x32xf32>, vector<32x128xf32>, vector<16x128xf32> -> vector<16x128xf32>
    %c0_6 = arith.constant 0 : index
    %c0_7 = arith.constant 0 : index
    %10 = vector.load %arg5[%c0_6, %c0_7] : memref<16x128xf32, #tpu.memory_space<vmem>>, vector<16x128xf32>
    tpu.vector_store %arg5[%c0_6, %c0_7], %9 {strides = array<i32>} : memref<16x128xf32, #tpu.memory_space<vmem>>, vector<16x128xf32>,
    return
  }
  func.func @transform_0(%arg0: i32, %arg1: i32) -> (i32, i32) {
    %c0_i32 = arith.constant 0 : i32
    %c0_i32_0 = arith.constant 0 : i32
    return %arg0, %c0_i32 : i32, i32
  }
  func.func @transform_1(%arg0: i32, %arg1: i32) -> (i32, i32) {
    %c0_i32 = arith.constant 0 : i32
    %c0_i32_0 = arith.constant 0 : i32
    %c0_i32_1 = arith.constant 0 : i32
    return %c0_i32, %c0_i32_0 : i32, i32
  }
  func.func @transform_2(%arg0: i32, %arg1: i32) -> (i32, i32) {
    %c0_i32 = arith.constant 0 : i32
    %c0_i32_0 = arith.constant 0 : i32
    return %c0_i32, %arg1 : i32, i32
  }
  func.func @transform_3(%arg0: i32, %arg1: i32) -> (i32, i32) {
    %c0_i32 = arith.constant 0 : i32
    return %arg0, %arg1 : i32, i32
  }
}

</mosaic_0001>

<bundles_post_ra>
// kernel: tpu_custom_call.1
= control target key start
LH: loop header
LB: loop body
LE: loop exit
PB: predicated region body
PF: predicated region fallthrough
CT: control target
= control target key end

     0   :  { %8 = vsyncpa [#allocation3], 0  ;;  %s419_s0 = inlined_call_operand.vmem [shape: s32[16,1], index: 0, kind: input, shape index: {}]   ;;  %s420_s1 = inlined_call_operand.hbm [shape: f32[32,32], index: 1, kind: input, shape index: {}]   ;;  %s421_s2 = inlined_call_operand.hbm [shape: f32[32,128], index: 2, kind: input, shape index: {}]   ;;  %s422_s3 = inlined_call_operand.hbm [shape: f32[16,128], index: 3, kind: output, shape index: {}]  }
   0x1   :  { %9 = vsyncpa [#allocation6], 0 }
   0x2   :  { %10 = vsyncpa [#allocation4], 0  ;;  %s364_s12 = smov [#allocation2]  }
   0x3   :  { %s18_s13 = sshll.u32 %s364_s12, 4  ;;  %s19_s13 = int_to_ptr.vmem [resolvable:$true] %s18_s13 }
   0x4   :  { %s306_s14 = scalar_lea.vmem %s19_s13, 512  ;;  %p311_p1 = scmp.lt.s32.totalorder %s19_s13, %s19_s13 }
   0x5   :  { %p307_p0 = scmp.ne.s32.totalorder %s19_s13, %s306_s14  ;;  %p312_p2 = scmp.lt.s32.totalorder %s306_s14, %s306_s14 }
   0x7   :  { %p313_p3 = por %p312_p2, %p311_p1 }
   0x9   :  { %p314_p4 = pnand %p313_p3, %p307_p0 }
   0xb   :  { %317 = shalt.err (!%p314_p4)
}
   0xc   :  { %s365_s15 = smov 128   ;;  %s366_s16 = smov 8  }
   0xd   :  { %24 = dma.hbm_to_vmem [thread:$0]  %s420_s1, 512, %s19_s13, [#allocation3], %s365_s15, %s365_s15, %s366_s16  }
   0xe   :  { %s367_s19 = smov [#allocation5]  }
   0xf   :  { %s30_s20 = sshll.u32 %s367_s19, 4  ;;  %s31_s20 = int_to_ptr.vmem [resolvable:$true] %s30_s20 }
  0x10   :  { %s326_s21 = scalar_lea.vmem %s31_s20, 512  ;;  %p331_p6 = scmp.lt.s32.totalorder %s31_s20, %s31_s20 }
  0x11   :  { %p327_p5 = scmp.ne.s32.totalorder %s31_s20, %s326_s21  ;;  %p332_p7 = scmp.lt.s32.totalorder %s326_s21, %s326_s21 }
  0x13   :  { %p333_p8 = por %p332_p7, %p331_p6 }
  0x15   :  { %p334_p9 = pnand %p333_p8, %p327_p5 }
  0x17   :  { %337 = shalt.err (!%p334_p9)
}
  0x18   :  { %36 = dma.hbm_to_vmem [thread:$0]  %s421_s2, 512, %s31_s20, [#allocation6], %s365_s15, %s365_s15, %s366_s16  }
  0x19   :  { %358 = dma.done.wait [#allocation3], 512  }
  0x1a   :  { %359 = vsyncadd [#allocation3], 4294966784 }
  0x1b   :  { %360 = dma.done.wait [#allocation6], 512  }
  0x1c   :  { %361 = vsyncadd [#allocation6], 4294966784  ;;  %v368_v0 = vmov 0   ;;  %v43_v1 = vld [vmem:[%s419_s0] sm:$0xff]  ;;  %v62_v2 = vld [vmem:[#allocation2 + $0x18] sm:$0xff]  ;;  %v45_v9 = vlaneseq  ;;  %vm63_vm0 = vcmask 261120  }
  0x1d   :  { %297 = vset.pattern.permute.xlu0 %v368_v0  ;;  %268 = vmatprep.subr.mxu0 %v62_v2  ;;  %v61_v3 = vld [vmem:[#allocation2 + $0x10] sm:$0xff]  ;;  %v44_v4 = vld [vmem:[%s419_s0 + $0x8] sm:$0xff]  ;;  %v148_v6 = vld [vmem:[#allocation5 + $0x18] sm:$0xff]  ;;  %v369_v12 = vmov 0.0   ;;  %s370_s0 = smov [#allocation7]  }
  0x1e   :  { %48 = vperm.xlu0 %297, %v43_v1   ;;  %269 = vmatpush3.msra.mxu0 %v62_v2  ;;  %v60_v5 = vld [vmem:[#allocation2 + $0x8] sm:$0xff]  ;;  %v59_v7 = vld [vmem:[#allocation2] sm:$0xff]  ;;  %v147_v8 = vld [vmem:[#allocation5 + $0x10] sm:$0xff]  ;;  %v46_v10 = vand.u32 127, %v45_v9  ;;  %s237_s2 = sshll.u32 %s370_s0, 4  ;;  %s238_s2 = int_to_ptr.vmem [resolvable:$true] %s237_s2 }
  0x1f   :  { %270 = vmatprep.subr.mxu0 %v61_v3  ;;  %279 = vmatprep.subr.mxu1 %v148_v6  ;;  %v146_v16 = vld [vmem:[#allocation5 + $0x8] sm:$0xff]  ;;  %v145_v17 = vld [vmem:[#allocation5] sm:$0xff]  ;;  %s338_s27 = scalar_lea.vmem %s238_s2, 256  ;;  %p343_p11 = scmp.lt.s32.totalorder %s238_s2, %s238_s2 }
  0x20   :  { %271 = vmatpush3.msra.mxu0 %v61_v3  ;;  %280 = vmatpush3.msra.mxu1 %v148_v6  ;;  %p339_p10 = scmp.ne.s32.totalorder %s238_s2, %s338_s27  ;;  %p344_p12 = scmp.lt.s32.totalorder %s338_s27, %s338_s27 }
  0x21   :  { %272 = vmatprep.subr.mxu0 %v60_v5  ;;  %281 = vmatprep.subr.mxu1 %v147_v8 }
  0x22   :  { %51 = vperm.xlu0 %297, %v44_v4   ;;  %273 = vmatpush3.msra.mxu0 %v60_v5  ;;  %p345_p13 = por %p344_p12, %p343_p11 }
  0x23   :  { %274 = vmatprep.subr.mxu0 %v59_v7  ;;  %282 = vmatpush3.msra.mxu1 %v147_v8 }
  0x24   :  { %275 = vmatpush3.msra.mxu0 %v59_v7  ;;  %283 = vmatprep.subr.mxu1 %v146_v16  ;;  %p346_p0 = pnand %p345_p13, %p339_p10 }
  0x25   :  { %284 = vmatpush3.msra.mxu1 %v146_v16 }
  0x26   :  { %285 = vmatprep.subr.mxu1 %v145_v17 }
  0x27   :  { %286 = vmatpush3.msra.mxu1 %v145_v17 }
  0x99   :  { %v49_v11 = vpop.permute.xlu0 %48 }
  0x9a   :  { %vm53_vm1 = vcmp.eq.s32.totalorder %v49_v11, %v46_v10 }
  0x9b   :  { %v250_v13 = vsel %vm53_vm1, 1.0, %v369_v12 }
  0x9c   :  { %276 = vmatprep.mubr.msk.f32.mxu0 %vm63_vm0, %v250_v13 }
  0x9d   :  { %v52_v14 = vpop.permute.xlu0 %51 }
  0x9e   :  { %vm54_vm2 = vcmp.eq.s32.totalorder %v52_v14, %v46_v10 }
  0x9f   :  { %v251_v15 = vsel %vm54_vm2, 1.0, %v369_v12 }
  0xa0   :  { %277 = vmatmul.mubr.msk.f32.vlgmr.msra.gmra.mxu0 %vm63_vm0, %v251_v15 }
 0x160   :  { %v278_v18 = vpop.f32.mrf.mxu0 }
 0x162   :  { %v136_v19 = vpop.f32.mrf.mxu0 }
 0x163   :  { %287 = vmatprep.mubr.msk.f32.mxu1 %vm63_vm0, %v136_v19 }
 0x164   :  { %288 = vmatmul.mubr.msk.f32.vlgmr.msra.gmra.mxu1 %vm63_vm0, %v278_v18 }
 0x224   :  { %v289_v20 = vpop.f32.mrf.mxu1 }
 0x225   :  { %231 = vst [vmem:[#allocation7 + $0x8] sm:$0xff] %v289_v20 }
 0x226   :  { %v221_v21 = vpop.f32.mrf.mxu1 }
 0x227   :  { %230 = vst [vmem:[#allocation7] sm:$0xff] %v221_v21 }
 0x228   :  { %349 = shalt.err (!%p346_p0)
}
 0x229   :  { %243 = dma.vmem_to_hbm [thread:$0]  %s238_s2, 256, %s422_s3, [#allocation4], %s365_s15, %s365_s15, %s366_s16  }
 0x22a   :  { %362 = dma.done.wait [#allocation4], 256  }
 0x22b   :  { %363 = vsyncadd [#allocation4], 4294967040 }
 0x22c   :  { %247 = vsyncpa [#allocation3], 1 }
 0x22d   :  { %248 = vsyncpa [#allocation6], 1 }
 0x22e   :  { %249 = vsyncpa [#allocation4], 1 }

</bundles_post_ra>
